<compile_context>
chip_gen: v7x
topology: tpu7x:2x2x1
jax: 0.10.0
libtpu: 0.0.40
codegen_flags: <defaults>
</compile_context>

<pallas_src>
import math

import jax
import jax.numpy as jnp
from jax.experimental import pallas as pl
from jax.experimental.pallas import tpu as pltpu


# --------------------------------------------------------------------- VMEM budgeting
def _vmem_budget():
    """(live-VMEM budget for kernel blocks, vmem_limit_bytes to request) per generation."""
    kind = ""
    try:
        kind = jax.devices()[0].device_kind.lower()
    except Exception:
        pass
    if "v5 lite" in kind or "v5e" in kind:
        return 18 << 20, 40 << 20      # 128 MiB physical, 16 MiB scoped default
    if "v6" in kind:
        return 28 << 20, 64 << 20      # 128 MiB physical, 32 MiB scoped default
    if "v7" in kind:
        return 22 << 20, 44 << 20      # 64 MiB physical per TC -- leave headroom
    return 20 << 20, 40 << 20          # conservative default (works on all gens)


def _gate_lane_tile(S, Wg, F_g, F_l, F_int, budget, max_lane_tile=None):
    """Kernel-1 lane tile: whole low-res rows (multiple of Wg) and a multiple of 128
    (or the full axis).  Capped at 512 lanes so the (t, 4t) expansion matrix stays
    small; kernel-1 traffic is secondary and 512-lane tiles are ~85% of HBM roofline."""
    align = Wg * 128 // math.gcd(Wg, 128)
    per_lane = 8 * (F_g + F_l) + 4 * F_int + 48      # 2x(g+xs) f32 + h + out blocks
    t = int((budget * 6 // 10) // max(per_lane, 1))  # leave ~40% for the expansion mat
    t = min(t, 512)
    if max_lane_tile is not None:
        t = min(t, int(max_lane_tile))
    t = (t // align) * align
    if t < align:
        t = align
    return S if t >= S else t


def _apply_lane_tile(HW, F_l, N, budget, max_lane_tile=None):
    """Kernel-2 lane tile, sized so live VMEM (3 x-bufs + 2 out-bufs + psi) fits."""
    per_lane = (5 * F_l + 2) * 4
    t = int(budget // max(per_lane, 1))
    if max_lane_tile is not None:
        t = min(t, int(max_lane_tile))
    t = max(128, (t // 128) * 128)
    if t >= HW:
        t = HW
        if N == 1 and HW >= 256:
            # keep >= 2 grid blocks so both v7x TensorCores get work
            t = min(HW, ((HW + 1) // 2 + 127) // 128 * 128)
    return t


# ------------------------------------------------------------ upsample expansion matrix
def _build_upsample_matrix(ts1, Wg, up_k):
    """Block-diagonal (ts1, 4*ts1) matrix U with
         U[r*Wg + w, r*4*Wg + di*2*Wg + 2*w + dj] = up_k[di, dj],
    mapping a row-major tile of low-res gates to the flat full-res (NCHW) layout of the
    ConvTranspose2d(1, 1, kernel=2, stride=2) output.  Doing the upsample as one MXU
    matmul avoids any in-kernel lane interleave / reshape and any XLA relayout glue."""
    w = jnp.arange(Wg)
    e = jnp.zeros((Wg, 4 * Wg), jnp.float32)
    for di in range(2):
        for dj in range(2):
            e = e.at[w, di * 2 * Wg + 2 * w + dj].set(up_k[di, dj])
    r = ts1 // Wg
    return jnp.kron(jnp.eye(r, dtype=jnp.float32), e)


# ----------------------------------------------------------------------- kernel 2: apply
def apply_gate_kernel(x_ref, psi_ref, out_ref):
    # (1, F_l, TS) * (1, 1, TS): lane-dense broadcast of the gate over channels.
    out_ref[...] = x_ref[...] * psi_ref[...]


# ---------------------------------------------------------------------------- wrapper
def attention_block_forward(g, x, params, *, max_lane_tile=None):
    """g: (N, F_g, Hg, Wg) NCHW, x: (N, F_l, 2*Hg, 2*Wg) NCHW -> (N, F_l, 2*Hg, 2*Wg)."""
    N, F_g, Hg, Wg = g.shape
    Nx, F_l, Hx, Wx = x.shape
    assert N == Nx
    # TODO(synk): bilinear-resize fallback (Hx != 2*Hg) not implemented.
    assert Hx == 2 * Hg and Wx == 2 * Wg
    F_int = params["wg"].shape[1]

    S, HW = Hg * Wg, Hx * Wx
    budget, vmem_limit = _vmem_budget()

    # ---- glue: free reshapes + one small (x/4-sized) stride-2 gather ----
    g3 = g.reshape(N, F_g, S)                              # NCHW is already contiguous
    # TODO(synk): fold the ::2,::2 subsample into kernel 1 (needs strided lane reads or a
    #             column-selection matmul); as XLA glue it costs ~0.75x of one x-read.
    xs3 = x[:, :, ::2, ::2].reshape(N, F_l, S)

    wg_t = params["wg"].T.astype(jnp.bfloat16)             # (F_int, F_g) MXU operand
    wx_t = params["wx"].T.astype(jnp.bfloat16)             # (F_int, F_l) MXU operand
    b = (params["bg"] + params["bx"]).reshape(F_int, 1).astype(jnp.float32)
    wpsi = params["wpsi"].reshape(F_int, 1).astype(jnp.float32)
    scal = jnp.stack([params["bpsi"][0], params["up_b"][0]]).astype(jnp.float32)

    ts1 = _gate_lane_tile(S, Wg, F_g, F_l, F_int, budget, max_lane_tile)
    U = _build_upsample_matrix(ts1, Wg, params["up_k"])    # (ts1, 4*ts1), resident

    # ------------------------------------------------------------------ kernel 1: gate
    def gate_kernel(g_ref, xs_ref, wg_ref, wx_ref, b_ref, wpsi_ref, u_ref, scal_ref,
                    psi_ref):
        # bf16 MXU operands (cast in-VMEM; HBM stays f32), f32 accumulation.
        gb = g_ref[0].astype(jnp.bfloat16)                               # (F_g, TS)
        xb = xs_ref[0].astype(jnp.bfloat16)                              # (F_l, TS)
        h = (jnp.dot(wg_ref[...], gb, preferred_element_type=jnp.float32)
             + jnp.dot(wx_ref[...], xb, preferred_element_type=jnp.float32)
             + b_ref[...])                                               # (F_int, TS)
        h = jnp.maximum(h, 0.0)                                          # f32 (v5e-safe)
        # psi 1x1 conv (F_int -> 1): VPU multiply + sublane reduce (keeps MXU slots free).
        p = jnp.sum(h * wpsi_ref[...], axis=0, keepdims=True) + scal_ref[0]
        p = jax.nn.sigmoid(p)                                            # (1, TS)
        # Zero lanes past the image so 0 * uninitialized-VMEM (possibly NaN) in the
        # ragged last tile can never leak into valid columns of the expansion matmul.
        lane = (jax.lax.broadcasted_iota(jnp.int32, p.shape, 1)
                + pl.program_id(1) * p.shape[1])
        p = jnp.where(lane < S, p, 0.0)
        # ConvTranspose2d(1,1,2,stride=2): one matmul against the block-diagonal
        # expansion matrix emits the gate already in flat full-res NCHW order.
        psi_ref[0] = (jnp.dot(p, u_ref[...], preferred_element_type=jnp.float32)
                      + scal_ref[1])                                     # (1, 4*TS)

    fixed = lambda n, s: (0, 0)
    psi_up = pl.pallas_call(
        gate_kernel,
        out_shape=jax.ShapeDtypeStruct((N, 1, HW), jnp.float32),
        grid=(N, pl.cdiv(S, ts1)),
        in_specs=[
            pl.BlockSpec((1, F_g, ts1), lambda n, s: (n, 0, s)),
            pl.BlockSpec((1, F_l, ts1), lambda n, s: (n, 0, s)),
            pl.BlockSpec((F_int, F_g), fixed),
            pl.BlockSpec((F_int, F_l), fixed),
            pl.BlockSpec((F_int, 1), fixed),
            pl.BlockSpec((F_int, 1), fixed),
            pl.BlockSpec((ts1, 4 * ts1), fixed),
            pl.BlockSpec(memory_space=pltpu.MemorySpace.SMEM),
        ],
        out_specs=pl.BlockSpec((1, 1, 4 * ts1), lambda n, s: (n, 0, s)),
        compiler_params=pltpu.CompilerParams(
            dimension_semantics=("parallel", "parallel"),
            vmem_limit_bytes=vmem_limit),
    )(g3, xs3, wg_t, wx_t, b, wpsi, U, scal)
    # psi_up is (N, 1, HW) already in flat full-res NCHW order -> no relayout glue.

    # ---- stage 2: gated skip connection in native (flat) NCHW layout ----
    x3 = x.reshape(N, F_l, HW)                             # free reshape
    ts2 = _apply_lane_tile(HW, F_l, N, budget, max_lane_tile)
    out3 = pl.pallas_call(
        apply_gate_kernel,
        out_shape=jax.ShapeDtypeStruct((N, F_l, HW), jnp.float32),
        grid=(N, pl.cdiv(HW, ts2)),
        in_specs=[
            pl.BlockSpec((1, F_l, ts2), lambda n, s: (n, 0, s),
                         pipeline_mode=pl.Buffered(3)),
            pl.BlockSpec((1, 1, ts2), lambda n, s: (n, 0, s)),
        ],
        out_specs=pl.BlockSpec((1, F_l, ts2), lambda n, s: (n, 0, s)),
        compiler_params=pltpu.CompilerParams(
            dimension_semantics=("parallel", "parallel"),
            vmem_limit_bytes=vmem_limit),
    )(x3, psi_up)

    return out3.reshape(N, F_l, Hx, Wx)                    # free reshape


# ---------------------------------------------------------------------------- params
def fold_bn(w, b, gamma, beta, mean, var, eps=1e-5):
    """Fold inference-mode BatchNorm into a 1x1 conv (w: (Cin, Cout), per-Cout BN)."""
    scale = gamma / jnp.sqrt(var + eps)
    return w * scale[None, :], (b - mean) * scale + beta


def make_params(key, F_g, F_l, F_int):
    ks = jax.random.split(key, 16)
    nrm = lambda k, s, sc=0.2: sc * jax.random.normal(k, s, dtype=jnp.float32)

    # W_g: Conv2d(F_g, F_int, 1) + BN(F_int)
    wg_raw, bg_raw = nrm(ks[0], (F_g, F_int)), nrm(ks[1], (F_int,))
    wg, bg = fold_bn(wg_raw, bg_raw,
                     1.0 + nrm(ks[2], (F_int,), 0.1), nrm(ks[3], (F_int,), 0.1),
                     nrm(ks[4], (F_int,), 0.05), 1.0 + jnp.abs(nrm(ks[5], (F_int,), 0.1)))
    # W_x: Conv2d(F_l, F_int, 1, stride=2) + BN(F_int)
    wx_raw, bx_raw = nrm(ks[6], (F_l, F_int)), nrm(ks[7], (F_int,))
    wx, bx = fold_bn(wx_raw, bx_raw,
                     1.0 + nrm(ks[8], (F_int,), 0.1), nrm(ks[9], (F_int,), 0.1),
                     nrm(ks[10], (F_int,), 0.05), 1.0 + jnp.abs(nrm(ks[11], (F_int,), 0.1)))
    # psi: Conv2d(F_int, 1, 1) + BN(1) (sigmoid + transpose-conv handled in kernel)
    wpsi_raw, bpsi_raw = nrm(ks[12], (F_int, 1)), nrm(ks[13], (1,))
    wpsi, bpsi = fold_bn(wpsi_raw, bpsi_raw,
                         jnp.ones((1,)), jnp.zeros((1,)),
                         jnp.zeros((1,)), jnp.ones((1,)))
    # ConvTranspose2d(1, 1, kernel_size=2, stride=2)
    up_k = nrm(ks[14], (2, 2), 0.5) + 1.0
    up_b = nrm(ks[15], (1,), 0.1)
    return dict(wg=wg, bg=bg, wx=wx, bx=bx, wpsi=wpsi, bpsi=bpsi, up_k=up_k, up_b=up_b)


# ---------------------------------------------------------------------------- reference
def reference_forward(g, x, params):
    """Pure-JAX NCHW reference reproducing the PyTorch forward (BN in eval, folded)."""
    N, F_l, Hx, Wx = x.shape
    g1 = jnp.einsum("nchw,cf->nfhw", g, params["wg"]) + params["bg"][None, :, None, None]
    xs = x[:, :, ::2, ::2]
    x1 = jnp.einsum("nchw,cf->nfhw", xs, params["wx"]) + params["bx"][None, :, None, None]
    a = jnp.maximum(g1 + x1, 0.0)
    p = jnp.einsum("nfhw,f->nhw", a, params["wpsi"][:, 0]) + params["bpsi"][0]
    p = jax.nn.sigmoid(p)                                   # (N, Hg, Wg)
    up = p[:, :, None, :, None] * params["up_k"][None, :, None, :][:, None]  # (N,Hg,2,Wg,2)
    up = up.reshape(N, Hx, Wx) + params["up_b"][0]
    return x * up[:, None, :, :]


# ---------------------------------------------------------------------------- main
if __name__ == "__main__":
    key = jax.random.PRNGKey(0)
    k1, k2, k3, k4, k5, k6 = jax.random.split(key, 6)

    # Test 1: small canonical shapes (single block per kernel).
    N, F_g, F_l, F_int = 2, 4, 4, 8
    Hg = Wg = 8
    Hx = Wx = 16
    g = jax.random.normal(k1, (N, F_g, Hg, Wg), dtype=jnp.float32)
    x = jax.random.normal(k2, (N, F_l, Hx, Wx), dtype=jnp.float32)
    params = make_params(k3, F_g, F_l, F_int)

    out = jax.block_until_ready(attention_block_forward(g, x, params))
    ref = reference_forward(g, x, params)
    assert out.shape == x.shape
    # bf16 MXU operands in kernel 1 -> compare against the f32 reference at a looser
    # tolerance (observed error is O(1e-3) at these scales).
    err = float(jnp.max(jnp.abs(out - ref)))
    assert jnp.allclose(out, ref, atol=2e-2, rtol=2e-2), err

    # Test 2: multi-block grids + ragged last lane tiles (forced small tile).
    N2, F_g2, F_l2, F_int2 = 1, 6, 10, 12
    Hg2 = Wg2 = 32
    Hx2 = Wx2 = 64
    g2 = jax.random.normal(k4, (N2, F_g2, Hg2, Wg2), dtype=jnp.float32)
    x2 = jax.random.normal(k5, (N2, F_l2, Hx2, Wx2), dtype=jnp.float32)
    params2 = make_params(k6, F_g2, F_l2, F_int2)

    out2 = jax.block_until_ready(
        attention_block_forward(g2, x2, params2, max_lane_tile=384))
    ref2 = reference_forward(g2, x2, params2)
    assert out2.shape == x2.shape
    err2 = float(jnp.max(jnp.abs(out2 - ref2)))
    assert jnp.allclose(out2, ref2, atol=2e-2, rtol=2e-2), err2

    print("KERNEL_OK")
</pallas_src>

<mosaic_0001>
module attributes {stable_mosaic.version = 11 : i64} {
  func.func @gate_kernel(%arg0: i32, %arg1: i32, %arg2: memref<1x4x64xf32, #tpu.memory_space<vmem>>, %arg3: memref<1x4x64xf32, #tpu.memory_space<vmem>>, %arg4: memref<8x4xbf16, #tpu.memory_space<vmem>>, %arg5: memref<8x4xbf16, #tpu.memory_space<vmem>>, %arg6: memref<8x1xf32, #tpu.memory_space<vmem>>, %arg7: memref<8x1xf32, #tpu.memory_space<vmem>>, %arg8: memref<64x256xf32, #tpu.memory_space<vmem>>, %arg9: memref<2xf32, #tpu.memory_space<smem>>, %arg10: memref<1x1x256xf32, #tpu.memory_space<vmem>>) attributes {dimension_semantics = [#tpu.dimension_semantics<parallel>, #tpu.dimension_semantics<parallel>], iteration_bounds = array<i64: 2, 1>, scalar_prefetch = 0 : i64, scratch_operands = 0 : i64, tpu.core_type = #tpu.core_type<tc>, window_params = [{transform_indices = @transform_0, window_bounds = array<i64: 1, 4, 64>}, {transform_indices = @transform_1, window_bounds = array<i64: 1, 4, 64>}, {pipeline_mode = #tpu.pipeline_mode<synchronous>, transform_indices = @transform_2, window_bounds = array<i64: 8, 4>}, {pipeline_mode = #tpu.pipeline_mode<synchronous>, transform_indices = @transform_3, window_bounds = array<i64: 8, 4>}, {pipeline_mode = #tpu.pipeline_mode<synchronous>, transform_indices = @transform_4, window_bounds = array<i64: 8, 1>}, {pipeline_mode = #tpu.pipeline_mode<synchronous>, transform_indices = @transform_5, window_bounds = array<i64: 8, 1>}, {pipeline_mode = #tpu.pipeline_mode<synchronous>, transform_indices = @transform_6, window_bounds = array<i64: 64, 256>}, {transform_indices = @transform_7, window_bounds = array<i64: 2>}, {transform_indices = @transform_8, window_bounds = array<i64: 1, 1, 256>}]} {
    %c0 = arith.constant 0 : index
    %c0_0 = arith.constant 0 : index
    %c0_1 = arith.constant 0 : index
    %0 = vector.load %arg2[%c0, %c0_0, %c0_1] : memref<1x4x64xf32, #tpu.memory_space<vmem>>, vector<1x4x64xf32>
    %1 = vector.shape_cast %0 : vector<1x4x64xf32> to vector<4x64xf32>
    %2 = arith.truncf %1 : vector<4x64xf32> to vector<4x64xbf16>
    %c0_2 = arith.constant 0 : index
    %c0_3 = arith.constant 0 : index
    %c0_4 = arith.constant 0 : index
    %3 = vector.load %arg3[%c0_2, %c0_3, %c0_4] : memref<1x4x64xf32, #tpu.memory_space<vmem>>, vector<1x4x64xf32>
    %4 = vector.shape_cast %3 : vector<1x4x64xf32> to vector<4x64xf32>
    %5 = arith.truncf %4 : vector<4x64xf32> to vector<4x64xbf16>
    %c0_5 = arith.constant 0 : index
    %c0_6 = arith.constant 0 : index
    %6 = vector.load %arg4[%c0_5, %c0_6] : memref<8x4xbf16, #tpu.memory_space<vmem>>, vector<8x4xbf16>
    %cst = arith.constant dense<0.000000e+00> : vector<8x64xf32>
    %7 = tpu.matmul %6, %2, %cst {dimension_numbers = #tpu.dot_dimension_numbers<[1], [0], [0], [1], [0, 0, 1, 1], [], []>} : vector<8x4xbf16>, vector<4x64xbf16>, vector<8x64xf32> -> vector<8x64xf32>
    %c0_7 = arith.constant 0 : index
    %c0_8 = arith.constant 0 : index
    %8 = vector.load %arg5[%c0_7, %c0_8] : memref<8x4xbf16, #tpu.memory_space<vmem>>, vector<8x4xbf16>
    %cst_9 = arith.constant dense<0.000000e+00> : vector<8x64xf32>
    %9 = tpu.matmul %8, %5, %cst_9 {dimension_numbers = #tpu.dot_dimension_numbers<[1], [0], [0], [1], [0, 0, 1, 1], [], []>} : vector<8x4xbf16>, vector<4x64xbf16>, vector<8x64xf32> -> vector<8x64xf32>
    %10 = arith.addf %7, %9 : vector<8x64xf32>
    %c0_10 = arith.constant 0 : index
    %c0_11 = arith.constant 0 : index
    %11 = vector.load %arg6[%c0_10, %c0_11] : memref<8x1xf32, #tpu.memory_space<vmem>>, vector<8x1xf32>
    %12 = vector.broadcast %11 : vector<8x1xf32> to vector<8x64xf32>
    %13 = arith.addf %10, %12 : vector<8x64xf32>
    %cst_12 = arith.constant 0.000000e+00 : f32
    %14 = vector.broadcast %cst_12 : f32 to vector<8x64xf32>
    %15 = arith.maximumf %13, %14 : vector<8x64xf32>
    %c0_13 = arith.constant 0 : index
    %c0_14 = arith.constant 0 : index
    %16 = vector.load %arg7[%c0_13, %c0_14] : memref<8x1xf32, #tpu.memory_space<vmem>>, vector<8x1xf32>
    %17 = vector.broadcast %16 : vector<8x1xf32> to vector<8x64xf32>
    %18 = arith.mulf %15, %17 : vector<8x64xf32>
    %cst_15 = arith.constant dense<0.000000e+00> : vector<64xf32>
    %19 = vector.multi_reduction <add>, %18, %cst_15 [0] : vector<8x64xf32> to vector<64xf32>
    %20 = vector.shape_cast %19 : vector<64xf32> to vector<1x64xf32>
    %c0_16 = arith.constant 0 : index
    %21 = memref.load %arg9[%c0_16] : memref<2xf32, #tpu.memory_space<smem>>
    %22 = vector.broadcast %21 : f32 to vector<1x64xf32>
    %23 = arith.addf %20, %22 : vector<1x64xf32>
    %24 = arith.negf %23 : vector<1x64xf32>
    %25 = math.exp %24 : vector<1x64xf32>
    %cst_17 = arith.constant 1.000000e+00 : f32
    %26 = vector.broadcast %cst_17 : f32 to vector<1x64xf32>
    %27 = arith.addf %26, %25 : vector<1x64xf32>
    %28 = arith.divf %26, %27 : vector<1x64xf32>
    %29 = tpu.iota {dimensions = array<i32: 1>} : vector<1x64xi32>
    %c64_i32 = arith.constant 64 : i32
    %30 = arith.muli %arg1, %c64_i32 : i32
    %31 = vector.broadcast %30 : i32 to vector<1x64xi32>
    %32 = arith.addi %29, %31 : vector<1x64xi32>
    %c64_i32_18 = arith.constant 64 : i32
    %33 = vector.broadcast %c64_i32_18 : i32 to vector<1x64xi32>
    %34 = arith.cmpi slt, %32, %33 : vector<1x64xi32>
    %cst_19 = arith.constant 0.000000e+00 : f32
    %35 = vector.broadcast %cst_19 : f32 to vector<1x64xf32>
    %36 = arith.select %34, %28, %35 : vector<1x64xi1>, vector<1x64xf32>
    %c0_20 = arith.constant 0 : index
    %c0_21 = arith.constant 0 : index
    %37 = vector.load %arg8[%c0_20, %c0_21] : memref<64x256xf32, #tpu.memory_space<vmem>>, vector<64x256xf32>
    %cst_22 = arith.constant dense<0.000000e+00> : vector<1x256xf32>
    %38 = tpu.matmul %36, %37, %cst_22 {dimension_numbers = #tpu.dot_dimension_numbers<[1], [0], [0], [1], [0, 0, 1, 1], [], []>} : vector<1x64xf32>, vector<64x256xf32>, vector<1x256xf32> -> vector<1x256xf32>
    %c1 = arith.constant 1 : index
    %39 = memref.load %arg9[%c1] : memref<2xf32, #tpu.memory_space<smem>>
    %40 = vector.broadcast %39 : f32 to vector<1x256xf32>
    %41 = arith.addf %38, %40 : vector<1x256xf32>
    %c0_23 = arith.constant 0 : index
    %c0_24 = arith.constant 0 : index
    %c0_25 = arith.constant 0 : index
    %42 = vector.load %arg10[%c0_23, %c0_24, %c0_25] : memref<1x1x256xf32, #tpu.memory_space<vmem>>, vector<1x1x256xf32>
    %43 = vector.shape_cast %42 : vector<1x1x256xf32> to vector<1x256xf32>
    %44 = vector.shape_cast %41 : vector<1x256xf32> to vector<1x1x256xf32>
    tpu.vector_store %arg10[%c0_23, %c0_24, %c0_25], %44 {strides = array<i32>} : memref<1x1x256xf32, #tpu.memory_space<vmem>>, vector<1x1x256xf32>,
    return
  }
  func.func @transform_0(%arg0: i32, %arg1: i32) -> (i32, i32, i32) {
    %c0_i32 = arith.constant 0 : i32
    %c0_i32_0 = arith.constant 0 : i32
    return %arg0, %c0_i32, %arg1 : i32, i32, i32
  }
  func.func @transform_1(%arg0: i32, %arg1: i32) -> (i32, i32, i32) {
    %c0_i32 = arith.constant 0 : i32
    %c0_i32_0 = arith.constant 0 : i32
    return %arg0, %c0_i32, %arg1 : i32, i32, i32
  }
  func.func @transform_2(%arg0: i32, %arg1: i32) -> (i32, i32) {
    %c0_i32 = arith.constant 0 : i32
    %c0_i32_0 = arith.constant 0 : i32
    %c0_i32_1 = arith.constant 0 : i32
    return %c0_i32, %c0_i32_0 : i32, i32
  }
  func.func @transform_3(%arg0: i32, %arg1: i32) -> (i32, i32) {
    %c0_i32 = arith.constant 0 : i32
    %c0_i32_0 = arith.constant 0 : i32
    %c0_i32_1 = arith.constant 0 : i32
    return %c0_i32, %c0_i32_0 : i32, i32
  }
  func.func @transform_4(%arg0: i32, %arg1: i32) -> (i32, i32) {
    %c0_i32 = arith.constant 0 : i32
    %c0_i32_0 = arith.constant 0 : i32
    %c0_i32_1 = arith.constant 0 : i32
    return %c0_i32, %c0_i32_0 : i32, i32
  }
  func.func @transform_5(%arg0: i32, %arg1: i32) -> (i32, i32) {
    %c0_i32 = arith.constant 0 : i32
    %c0_i32_0 = arith.constant 0 : i32
    %c0_i32_1 = arith.constant 0 : i32
    return %c0_i32, %c0_i32_0 : i32, i32
  }
  func.func @transform_6(%arg0: i32, %arg1: i32) -> (i32, i32) {
    %c0_i32 = arith.constant 0 : i32
    %c0_i32_0 = arith.constant 0 : i32
    %c0_i32_1 = arith.constant 0 : i32
    return %c0_i32, %c0_i32_0 : i32, i32
  }
  func.func @transform_7(%arg0: i32, %arg1: i32) -> i32 {
    %c0_i32 = arith.constant 0 : i32
    %c0_i32_0 = arith.constant 0 : i32
    return %c0_i32 : i32
  }
  func.func @transform_8(%arg0: i32, %arg1: i32) -> (i32, i32, i32) {
    %c0_i32 = arith.constant 0 : i32
    %c0_i32_0 = arith.constant 0 : i32
    return %arg0, %c0_i32, %arg1 : i32, i32, i32
  }
}

</mosaic_0001>

<bundles_post_ra>
// kernel: tpu_custom_call.1
= control target key start
LH: loop header
LB: loop body
LE: loop exit
PB: predicated region body
PF: predicated region fallthrough
CT: control target
= control target key end

     0   :  { %s1289_s0 = inlined_call_operand.vmem [shape: f32[2,4,64], index: 0, kind: input, shape index: {}]   ;;  %s1290_s1 = inlined_call_operand.vmem [shape: f32[2,4,64], index: 1, kind: input, shape index: {}]   ;;  %s1291_s2 = inlined_call_operand.vmem [shape: bf16[8,4], index: 2, kind: input, shape index: {}]   ;;  %s1292_s3 = inlined_call_operand.vmem [shape: bf16[8,4], index: 3, kind: input, shape index: {}]   ;;  %s1293_s4 = inlined_call_operand.vmem [shape: f32[8,1], index: 4, kind: input, shape index: {}]   ;;  %s1294_s5 = inlined_call_operand.vmem [shape: f32[8,1], index: 5, kind: input, shape index: {}]   ;;  %s1295_s6 = inlined_call_operand.hbm [shape: f32[64,256], index: 6, kind: input, shape index: {}]   ;;  %s1296_s7 = inlined_call_operand.vmem [shape: f32[2], index: 7, kind: input, shape index: {}]   ;;  %s1297_s8 = inlined_call_operand.hbm [shape: f32[2,1,256], index: 8, kind: output, shape index: {}]  }
   0x1   :  { %1302 = sst [smem:[#allocation11_spill]] %s1296_s7 }
   0x2   :  { %13 = vsyncpa [#allocation3], 0 }
   0x3   :  { %14 = vsyncpa [#allocation5], 0 }
   0x4   :  { %15 = vsyncpa [#allocation4], 0 }
   0x5   :  { %17 = vsyncpa [#allocation4 + $0x1], 0  ;;  %s1095_s27 = smov 0   ;;  %s1097_s28 = smov 0  }
   0x6   :  { %s1099_s29 = smov 0   ;;  %s1101_s30 = smov 0  }
   0x7   :  { %s1103_s9 = smov 0   ;;  %s1105_s10 = smov 0  }
   0x8 LB: > { %s768_s11 = sadd.s32 4294967295, %s1039_s10   ;;  %s769_s12 = sadd.s32 4294967294, %s1039_s10   ;;  %s1039_s10 = sphi %s1105_s10, %s23_s10   ;;  %s1035_s9 = sphi %s1103_s9, %s1317_s9   ;;  %s1031_s30 = sphi %s1101_s30, %s1316_s30   ;;  %s1027_s29 = sphi %s1099_s29, %s1315_s29   ;;  %s1023_s28 = sphi %s1097_s28, %s1314_s28   ;;  %s1019_s27 = sphi %s1095_s27, %s1313_s27  }
   0x9   : > { %s35_s13 = sadd.s32 1, %s1035_s9  ;;  %s226_s14 = sadd.s32 1, %s1027_s29 }
   0xa   : > { %p37_p0 = scmp.ge.s32.totalorder %s35_s13, 2  ;;  %p236_p1 = scmp.ne.s32.totalorder %s1027_s29, %s1023_s28 }
   0xb   : > { %p237_p2 = scmp.eq.s32.totalorder %s768_s11, 1  ;;  %p242_p3 = scmp.ne.s32.totalorder %s1023_s28, %s1019_s27 }
   0xc   : > { %s1319_s13 = smov (%p37_p0, %s35_s13), 0  ;;  %p243_p5 = scmp.eq.s32.totalorder %s769_s12, 1 }
   0xd   : > { %p1135_p4 = por %p237_p2, %p236_p1  ;;  %s221_s16 = ssub.s32 %s1035_s9, %s1319_s13 }
   0xe   : > { %p770_p6 = scmp.ge.s32.totalorder %s1039_s10, 1  ;;  %p224_p7 = scmp.eq.s32.totalorder %s221_s16, 0 }
   0xf   : > { %s1303_s15 = scalar_select %p1135_p4, 1, 0 }
  0x10   : > { %p1142_p8 = por %p243_p5, %p242_p3  ;;  %p250_p9 = scmp.lt.s32.totalorder %s1039_s10, 3 }
  0x11   : > { %s1148_s18 = scalar_select %p224_p7, %s1027_s29, %s226_s14  }
  0x12   : > { %s1304_s17 = scalar_select %p1142_p8, 1, 0 }
  0x13   : > { %p1150_p10 = pnand %p770_p6, %p250_p9  ;;  %p1154_p11 = scmp.eq.s32.totalorder %s768_s11, 0 }
  0x14   : > { %s1041_s21 = smov [#allocation2]   ;;  %s1308_s7 = sld [smem:[#allocation11_spill]] }
  0x15   : > { %s1305_s19 = scalar_select %p1150_p10, 1, 0 }
  0x16   : > { %s1306_s20 = scalar_select %p1154_p11, 1, 0 }
  0x17   : > { %p833_p12 = pneg %p1150_p10  ;;  %s274_s22 = sshll.u32 %s1041_s21, 4  ;;  %s275_s22 = int_to_ptr.vmem [resolvable:$true] %s274_s22 }
  0x18   : > { %s910_s14 = scalar_lea.hbm %s1295_s6, 2048 }
  0x19   : > { %p1162_p13 = pnand %p1154_p11, %p833_p12  ;;  %p911_p0 = scmp.ne.s32.totalorder %s1295_s6, %s910_s14 }
  0x1a   : > { %s288_s26 = sshll.u32 %s1308_s7, 4  ;;  %p917_p5 = scmp.lt.u32.totalorder %s910_s14, %s1295_s6  ;;  %s1169_s26 = int_to_ptr.vmem [resolvable:$true] %s288_s26 }
  0x1b   : > { %p912_p1 = pneg %p1162_p13 }
  0x1d   : > { %p913_p2 = pnand %p912_p1, %p911_p0 }
  0x1f   : > { %p914_p3 = pneg %p913_p2 }
  0x21   : > { %p919_p6 = pnand %p917_p5, %p914_p3 }
  0x23   : > { %922 = shalt.err (!%p919_p6)
}
  0x24   : > { %s923_s7 = scalar_lea.vmem %s275_s22, 2048  ;;  %p931_p8 = scmp.lt.s32.totalorder %s275_s22, %s275_s22 }
  0x25   : > { %p924_p7 = scmp.ne.s32.totalorder %s275_s22, %s923_s7  ;;  %p932_p4 = scmp.lt.s32.totalorder %s923_s7, %s923_s7 }
  0x27   : > { %p926_p9 = pnand %p924_p7, %p912_p1  ;;  %p933_p11 = por %p932_p4, %p931_p8 }
  0x29   : > { %p927_p12 = pneg %p926_p9 }
  0x2b   : > { %p934_p10 = pnand %p933_p11, %p927_p12 }
  0x2d   : > { %937 = shalt.err (!%p934_p10)
}
  0x2e   : > { %s1042_s11 = smov 256   ;;  %s1043_s12 = smov 16  }
  0x2f   : > { %836 = dma.hbm_to_vmem [thread:$0]  (!%p1162_p13), %s1295_s6, 2048, %s275_s22, [#allocation3], %s1042_s11, %s1042_s11, %s1043_s12  }
  0x30   : > { %s938_s21 = scalar_lea.vmem %s1169_s26, 16  ;;  %p946_p8 = scmp.lt.s32.totalorder %s1169_s26, %s1169_s26 }
  0x31   : > { %p939_p0 = scmp.ne.s32.totalorder %s1169_s26, %s938_s21  ;;  %p947_p10 = scmp.lt.s32.totalorder %s938_s21, %s938_s21 }
  0x33   : > { %p941_p2 = pnand %p939_p0, %p912_p1  ;;  %p948_p11 = por %p947_p10, %p946_p8 }
  0x35   : > { %p942_p4 = pneg %p941_p2 }
  0x37   : > { %p949_p3 = pnand %p948_p11, %p942_p4 }
  0x39   : > { %952 = shalt.err (!%p949_p3)
}
  0x3a   : > { %s1044_s7 = smov [#allocation6]   ;;  %p1309_p5 = scmp.ne.s32.totalorder %s1305_s19, 0 }
  0x3b   : > { %839 = dma.vmem_to_smem (!%p1162_p13), %s1169_s26, 16, %s1044_s7, [#allocation5]  }
  0x3c   : > { %321 = sbr.rel (%p1309_p5) target bundleno = 591 (0x24f), region = 52  ;;  %p1310_p6 = scmp.ne.s32.totalorder (!%p1309_p5), %s1306_s20, 0 }
  0x43   : > { %1006 = dma.done.wait (%p1310_p6), [#allocation3], 2048  }
  0x44   : > { %1008 = vsyncadd (%p1310_p6), [#allocation3], 4294965248 }
  0x45   : > { %1010 = dma.done.wait (%p1310_p6), [#allocation5], 16  }
  0x46   : > { %1012 = vsyncadd (%p1310_p6), [#allocation5], 4294967280 }
  0x47   : > { %331 = sfence }
  0x48   : > { %p369_p1 = scmp.lt.s32.totalorder %s1031_s30, 1  ;;  %v1045_v0 = vmov 0.0   ;;  %vm1046_vm0 = vmmov 0   ;;  %v485_v1 = vld [vmem:[%s1293_s4] sm:$0xff]  ;;  %v1047_v2 = vmov 0   ;;  %vm395_vm1 = vcmask 1041408  }
  0x49   : > { %795 = vmatprep.subr.bf16.mxu1 %v1045_v0  ;;  %797 = vmatprep.mubr.msk.bf16.mxu1 %vm1046_vm0, %v1045_v0  ;;  %v493_v3 = vld [vmem:[%s1294_s5] sm:$0xff]  ;;  %vm391_vm2 = vcmask 31744   ;;  %v525_v12 = vld [vmem:[#allocation2 + $0x8] sm:$0xff]  ;;  %v527_v13 = vld [vmem:[#allocation2 + $0x18] sm:$0xff]  ;;  %vm500_vm3 = vcmask 523264   ;;  %v517_v62 = vlaneseq  ;;  %s783_s26 = sld [smem:[#allocation6 + $0x1]] }
  0x4a   : > { %s370_s23 = scalar_select %p369_p1, %s1031_s30, 1  ;;  %905 = vset.pattern.permute.xlu0 %v1047_v2  ;;  %609 = vmatprep.mubr.f32.mxu0 %v1045_v0  ;;  %v390_v9 = vld [vmem:[%s1292_s3] sm:$0xf]  ;;  %v807_v14 = vpack.c.bf16 %v527_v13, %v525_v12  ;;  %v526_v16 = vld [vmem:[#allocation2 + $0x10] sm:$0xff]  ;;  %v529_v18 = vld [vmem:[#allocation2 + $0x28] sm:$0xff] }
  0x4b   : > { %488 = vperm.xlu0 %905, %v485_v1   ;;  %v389_v11 = vld [vmem:[%s1291_s2] sm:$0xf]  ;;  %v531_v19 = vld [vmem:[#allocation2 + $0x38] sm:$0xff]  ;;  %v530_v22 = vld [vmem:[#allocation2 + $0x30] sm:$0xff]  ;;  %v518_v63 = vand.u32 127, %v517_v62  ;;  %s366_s24 = sand.u32 1, %s1023_s28  }
  0x4c   : > { %s778_s20 = sshll.u32 %s370_s23, 2  ;;  %v524_v15 = vld [vmem:[#allocation2] sm:$0xff]  ;;  %808 = vmatprep.subr.bf16.mxu0 %v807_v14  ;;  %v811_v20 = vpack.c.bf16 %v531_v19, %v529_v18  ;;  %v533_v24 = vld [vmem:[#allocation2 + $0x48] sm:$0xff]  ;;  %v535_v25 = vld [vmem:[#allocation2 + $0x58] sm:$0xff]  ;;  %v1048_v2 = vmov 1966171168  }
  0x4d   : > { %s375_s12 = scalar_lea.vmem %s1289_s0, %s778_s20  ;;  %s382_s21 = scalar_lea.vmem %s1290_s1, %s778_s20  ;;  %v809_v17 = vpack.c.bf16 %v526_v16, %v524_v15  ;;  %v528_v21 = vld [vmem:[#allocation2 + $0x20] sm:$0xff]  ;;  %v815_v27 = vpack.c.bf16 %v535_v25, %v533_v24  ;;  %v534_v28 = vld [vmem:[#allocation2 + $0x50] sm:$0xff]  ;;  %v537_v29 = vld [vmem:[#allocation2 + $0x68] sm:$0xff]  ;;  %vm522_vm4 = vcmp.lt.s32.totalorder %v518_v63, 64  ;;  %vm636_vm5 = vcmp.lt.s32.totalorder %v517_v62, 256 }
  0x4e   : > { %v385_v4 = vld [vmem:[%s375_s12] sm:$0xf]  ;;  %v813_v23 = vpack.c.bf16 %v530_v22, %v528_v21  ;;  %v539_v30 = vld [vmem:[#allocation2 + $0x78] sm:$0xff]  ;;  %v538_v34 = vld [vmem:[#allocation2 + $0x70] sm:$0xff]  ;;  %s508_s20 = sld [smem:[#allocation6]]  ;;  %s777_s25 = sshll.u32 %s366_s24, 1 }
  0x4f   : > { %v387_v5 = vld [vmem:[%s382_s21] sm:$0xf]  ;;  %v386_v6 = vpack.c.bf16 %v385_v4, %v385_v4  ;;  %496 = vperm.xlu0 %905, %v493_v3   ;;  %810 = vmatpush1.bf16.msra.mxu0 %v809_v17  ;;  %v819_v32 = vpack.c.bf16 %v539_v30, %v537_v29  ;;  %v620_v3 = vunpack.c.l.s4 %v1048_v2  ;;  %v541_v4 = vstv %s783_s26  ;;  %s790_s11 = sshll.u32 %s1031_s30, 5  ;;  %s368_s12 = scalar_lea.vmem [#allocation7], %s777_s25 }
  0x50   : > { %v388_v7 = vpack.c.bf16 %v387_v5, %v387_v5  ;;  %812 = vmatprep.subr.bf16.mxu0 %v811_v20  ;;  %v532_v26 = vld [vmem:[#allocation2 + $0x40] sm:$0xff]  ;;  %s656_s14 = sshll.u32 %s368_s12, 4  ;;  %s1242_s7 = scalar_lea.hbm %s1297_s8, %s790_s11  ;;  %s1244_s14 = int_to_ptr.vmem [resolvable:$true] %s656_s14 }
  0x51   : > { %v443_v10 = vsel %vm395_vm1, %v386_v6, 0  ;;  %v817_v31 = vpack.c.bf16 %v534_v28, %v532_v26  ;;  %v536_v33 = vld [vmem:[#allocation2 + $0x60] sm:$0xff]  ;;  %v621_v5 = vunpack.c.0.s8 %v620_v3  ;;  %v623_v6 = vshrl.u32 %v517_v62, 7  ;;  %s640_s19 = scalar_lea.sflag [#allocation4], %s366_s24  ;;  %s953_s22 = scalar_lea.vmem %s1244_s14, 32 }
  0x52   : > { %v397_v8 = vsel %vm395_vm1, %v388_v7, 0  ;;  %v821_v35 = vpack.c.bf16 %v538_v34, %v536_v33  ;;  %p954_p13 = scmp.ne.s32.totalorder %s1244_s14, %s953_s22  ;;  %p1311_p7 = scmp.ne.s32.totalorder %s1303_s15, 0 }
  0x53   : > { %796 = vmatpush3.bf16.msra.mxu1 %v397_v8  ;;  %814 = vmatpush1.bf16.msra.mxu0 %v813_v23  ;;  %s1049_s30 = smov [#allocation7]  }
  0x54   : > { %801 = vmatprep.subr.bf16.mxu1 %v1045_v0  ;;  %816 = vmatprep.subr.bf16.mxu0 %v815_v27  ;;  %v509_v56 = vstv %s508_s20  ;;  %p955_p9 = pnand %p954_p13, %p1311_p7  ;;  %s957_s23 = sshll.u32 %s1049_s30, 4  ;;  %s958_s23 = int_to_ptr.vmem [resolvable:$false] %s957_s23 }
  0x55   : > { %s959_s20 = scalar_lea.vmem %s958_s23, 64  ;;  %p960_p0 = scmp.lt.s32.totalorder %s1244_s14, %s958_s23 }
  0x56   : > { %798 = vmatmul.mubr.msk.bf16.vlgmr.msra.gmra.mrb[0].mxu1 %vm391_vm2, %v390_v9  ;;  %p956_p12 = pneg %p955_p9  ;;  %p961_p2 = scmp.lt.s32.totalorder %s959_s20, %s953_s22 }
  0x57   : > { %802 = vmatpush3.bf16.msra.mxu1 %v443_v10  ;;  %803 = vmatprep.mubr.msk.bf16.mxu1 %vm1046_vm0, %v1045_v0 }
  0x58   : > { %818 = vmatpush1.bf16.msra.mxu0 %v817_v31  ;;  %p962_p4 = por %p961_p2, %p960_p0 }
  0x59   : > { %820 = vmatprep.subr.bf16.mxu0 %v819_v32 }
  0x5a   : > { %p963_p8 = pnand %p962_p4, %p956_p12 }
  0x5c   : > { %822 = vmatpush1.bf16.msra.mxu0 %v821_v35 }
  0x5e   : > { %804 = vmatmul.mubr.msk.bf16.vlgmr.msra.gmra.mrb[4].mxu1 %vm391_vm2, %v389_v11  ;;  %v624_v11 = vsub.s32 %v621_v5, %v623_v6 }
  0xca   : > { %v489_v40 = vpop.permute.xlu0 %488 }
  0xce   : > { %v497_v48 = vpop.permute.xlu0 %496 }
 0x129   : > { %v433_v36 = vpop.f32.mrb[0].mxu1 }
 0x12a   : > { %v799_v37 = vpop.f32.mrb[1].mxu1 }
 0x12b   : > { %v436_v38 = vpop.f32.mrb[2].mxu1 }
 0x12c   : > { %v800_v39 = vpop.f32.mrb[3].mxu1 }
 0x131   : > { %v479_v41 = vpop.f32.mrb[4].mxu1 }
 0x132   : > { %v480_v42 = vadd.f32 %v479_v41, %v433_v36  ;;  %v805_v43 = vpop.f32.mrb[5].mxu1 }
 0x133   : > { %v482_v44 = vpop.f32.mrb[6].mxu1 }
 0x134   : > { %v491_v45 = vadd.f32 %v489_v40, %v480_v42  ;;  %v806_v46 = vpop.f32.mrb[7].mxu1 }
 0x136   : > { %v492_v47 = vmax.f32 %v491_v45, 0.0 }
 0x138   : > { %v499_v49 = vmul.f32 %v497_v48, %v492_v47 }
 0x13a   : > { %v501_v50 = vsel %vm500_vm3, %v499_v49, 0.0 }
 0x13b   : > { %v502_v51 = vrot.slane %v501_v50, 4 }
 0x13d   : > { %v503_v52 = vadd.f32 %v502_v51, %v501_v50 }
 0x13f   : > { %v504_v53 = vrot.slane %v503_v52, 2 }
 0x141   : > { %v505_v54 = vadd.f32 %v504_v53, %v503_v52 }
 0x143   : > { %v506_v55 = vrot.slane %v505_v54, 1 }
 0x145   : > { %v507_v57 = vadd.f32 %v506_v55, %v505_v54 }
 0x147   : > { %v510_v58 = vadd.f32 %v509_v56, %v507_v57 }
 0x149   : > { %v782_v59 = vmul.f32 -1.442695, %v510_v58 }
 0x14b   : > { %906 = vpow2.f32 %v782_v59 }
 0x155   : > { %v907_v60 = vpop.eup %906 }
 0x156   : > { %v514_v61 = vadd.f32 1.0, %v907_v60 }
 0x158   : > { %908 = vrcp.f32 %v514_v61 }
 0x162   : > { %v909_v0 = vpop.eup %908 }
 0x163   : > { %v523_v1 = vsel %vm522_vm4, %v909_v0, 0.0 }
 0x164   : > { %784 = vmatmul.mubr.msk.f32.vlgmr.msra.gmra.mrb[0].mxu0 %vm500_vm3, %v523_v1 }
 0x237   : > { %v611_v7 = vpop.f32.mrb[0].mxu0 }
 0x238   : > { %v612_v8 = vadd.f32 %v611_v7, %v541_v4  ;;  %v613_v9 = vpop.f32.mrb[1].mxu0 }
 0x239   : > { %v614_v10 = vadd.f32 %v613_v9, %v541_v4 }
 0x23b   : > { %v618_v12 = vcombine.low %v612_v8, %v614_v10 }
 0x23d   : > { %v625_v13 = vrot.slane %v618_v12, %v624_v11 }
 0x23f   : > { %v632_v14 = vrot.slane %v625_v13, %v624_v11 }
 0x241   : > { %638 = vst.msk [vmem:[%s368_s12] sm:$0x3] %vm636_vm5, %v632_v14 }
 0x242   : > { %966 = shalt.err (!%p963_p8)
}
 0x243   : > { %s967_s26 = scalar_lea.hbm %s1242_s7, 32  ;;  %s971_s11 = scalar_lea.hbm %s1297_s8, 64 }
 0x244   : > { %p968_p10 = scmp.ne.s32.totalorder %s1242_s7, %s967_s26  ;;  %p972_p5 = scmp.lt.u32.totalorder %s1242_s7, %s1297_s8 }
 0x245   : > { %p973_p6 = scmp.lt.u32.totalorder %s971_s11, %s967_s26  ;;  %p975_p13 = scmp.lt.u32.totalorder %s967_s26, %s1242_s7 }
 0x246   : > { %p969_p11 = pnand %p968_p10, %p1311_p7 }
 0x247   : > { %p974_p1 = por %p973_p6, %p972_p5 }
 0x248   : > { %p970_p3 = pneg %p969_p11 }
 0x249   : > { %p976_p9 = por %p975_p13, %p974_p1 }
 0x24b   : > { %p977_p12 = pnand %p976_p9, %p970_p3 }
 0x24d   : > { %980 = shalt.err (!%p977_p12)
}
 0x24e   : > { %831 = dma.vmem_to_hbm [thread:$0]  (%p1311_p7), %s1244_s14, 32, %s1242_s7, %s640_s19  }
 0x24f PF: > { %p848_p0 = scmp.ge.s32.totalorder %s1039_s10, 2  ;;  %s668_s21 = sand.u32 1, %s1019_s27  }
 0x250   : > { %p1312_p2 = scmp.ne.s32.totalorder %s1304_s17, 0  ;;  %s669_s22 = scalar_lea.sflag [#allocation4], %s668_s21 }
 0x252   : > { %p841_p4 = pnand %p848_p0, %p1312_p2 }
 0x254   : > { %1014 = dma.done.wait (!%p841_p4), %s669_s22, 32  }
 0x255   : > { %1016 = vsyncadd (!%p841_p4), %s669_s22, 4294967264  ;;  %s23_s10 = sadd.s32 1, %s1039_s10   ;;  %s1313_s27 = smov %s1023_s28 }
 0x256   : > { %p20_p8 = scmp.ge.s32.totalorder %s23_s10, 4   ;;  %s1314_s28 = smov %s1027_s29 }
 0x257   : > { %s1315_s29 = smov %s1148_s18  ;;  %s1316_s30 = smov %s1035_s9 }
 0x258   : > { %s1317_s9 = smov %s1319_s13  ;;  %22 = sbr.rel (!%p20_p8) target bundleno = 8 (0x8), region = 100 }
 0x25f   :  { %674 = vsyncpa [#allocation3], 1 }
 0x260   :  { %676 = vsyncpa [#allocation3 + $0x1], 1 }
 0x261   :  { %677 = vsyncpa [#allocation4], 1 }
 0x262   :  { %679 = vsyncpa [#allocation4 + $0x1], 1 }
 0x263   :  { %680 = vsyncpa [#allocation5], 1 }
 0x264   :  { %682 = vsyncpa [#allocation5 + $0x1], 1 }

</bundles_post_ra>
